<compile_context>
chip_gen: v7x
topology: tpu7x:2x2x1
jax: 0.10.0
libtpu: 0.0.40
codegen_flags: <defaults>
</compile_context>

<pallas_src>
import functools

import jax
import jax.numpy as jnp
from jax.experimental import pallas as pl
from jax.experimental.pallas import tpu as pltpu

_LANES = 128  # lane width; last block dim is always a multiple of 128


def _cdiv(a: int, b: int) -> int:
    return -(-a // b)


def _round_up(a: int, b: int) -> int:
    return _cdiv(a, b) * b


def _tpu_tuning():
    """Per-chip tuning: (target_block_bytes, vmem_limit_bytes, num_tensorcores)."""
    target_block_bytes = 4 << 20   # ~85%+ of HBM roofline on v5e/v6e
    vmem_limit = 32 << 20          # raise v5e's 16 MiB scoped default
    num_tc = 1
    try:
        kind = jax.devices()[0].device_kind.lower()
        if "v7" in kind:
            # v7x: 3.2 TB/s HBM -> bigger blocks to keep DMA time >> 0.35 us/step;
            # 2 TensorCores share the "parallel" grid axis.
            target_block_bytes = 8 << 20
            vmem_limit = 48 << 20  # 2 x (in + out) x 8 MiB = 32 MiB << 64 MiB phys
            num_tc = 2
    except Exception:
        pass
    return target_block_bytes, vmem_limit, num_tc


def _envelope_kernel(x_ref, o_ref, *, p, a, b, c):
    x = x_ref[...]
    # Static integer exponent -> multiply chain on the VPU (lax.integer_pow).
    x_pow_p0 = x ** (p - 1)
    x_pow_p1 = x_pow_p0 * x
    x_pow_p2 = x_pow_p1 * x
    env = 1.0 / x + a * x_pow_p0 + b * x_pow_p1 + c * x_pow_p2
    # Single vselect instead of compare + cast + multiply.
    o_ref[...] = jnp.where(x < 1.0, env, jnp.zeros_like(env))


def envelope(x, exponent: int):
    """Apply the DimeNet++ envelope elementwise to an array of any shape."""
    p = exponent + 1
    a = -(p + 1) * (p + 2) / 2.0
    b = float(p * (p + 2))
    c = -p * (p + 1) / 2.0

    orig_shape = x.shape
    dtype = x.dtype
    itemsize = jnp.dtype(dtype).itemsize
    flat = x.reshape(-1)
    n = flat.shape[0]
    if n == 0:
        return x

    # Dtype-aware minimum sublane tile: 8 (f32), 16 (bf16), 32 (int8/fp8).
    sublane = max(8, 32 // itemsize)
    lanes = _LANES
    target_block_bytes, vmem_limit, num_tc = _tpu_tuning()

    # Lane-alignment padding only (<= 127 elements). For aligned inputs this is
    # a no-op and the whole path is copy-free (reshape of a contiguous array).
    pad = (-n) % lanes
    if pad:
        # Pad value 2.0 is outside the cutoff (x >= 1) -> envelope is exactly 0,
        # so the padded tail is finite and simply sliced off afterwards.
        flat = jnp.pad(flat, (0, pad), constant_values=2.0)
    rows = (n + pad) // lanes
    x2d = flat.reshape(rows, lanes)

    # Rows per block so a block is ~target_block_bytes (multiple of sublane).
    rows_cap = max(sublane,
                   (target_block_bytes // (lanes * itemsize)) // sublane * sublane)
    if rows <= rows_cap:
        # Whole array fits in one block.
        min_steps = 2 * num_tc  # >=2 pipelined steps per TensorCore on v7x
        if num_tc > 1 and rows >= min_steps * sublane:
            tile_m = _round_up(_cdiv(rows, min_steps), sublane)
        else:
            # Single-TC chips (v5e/v6e): one block, no extra grid-step overhead.
            # tile_m == full row extent is exempt from the sublane-divisibility rule.
            tile_m = rows
    else:
        tile_m = rows_cap
    grid_m = _cdiv(rows, tile_m)  # last block may be partial; Pallas masks it

    kernel = functools.partial(_envelope_kernel, p=p, a=a, b=b, c=c)
    out2d = pl.pallas_call(
        kernel,
        out_shape=jax.ShapeDtypeStruct((rows, lanes), dtype),
        grid=(grid_m,),
        in_specs=[pl.BlockSpec((tile_m, lanes), lambda i: (i, 0))],
        out_specs=pl.BlockSpec((tile_m, lanes), lambda i: (i, 0)),
        compiler_params=pltpu.CompilerParams(
            dimension_semantics=("parallel",),
            vmem_limit_bytes=vmem_limit,
        ),
        cost_estimate=pl.CostEstimate(
            flops=12 * rows * lanes,
            transcendentals=0,
            bytes_accessed=2 * rows * lanes * itemsize,
        ),
    )(x2d)

    out = out2d.reshape(-1)
    if pad:
        out = out[:n]
    return out.reshape(orig_shape)


def envelope_ref(x, exponent: int):
    """Pure-JAX reference mirroring the PyTorch forward."""
    p = exponent + 1
    a = -(p + 1) * (p + 2) / 2.0
    b = float(p * (p + 2))
    c = -p * (p + 1) / 2.0
    x_pow_p0 = x ** (p - 1)
    x_pow_p1 = x_pow_p0 * x
    x_pow_p2 = x_pow_p1 * x
    return (1.0 / x + a * x_pow_p0 + b * x_pow_p1 + c * x_pow_p2) * (
        x < 1.0
    ).astype(x.dtype)


if __name__ == "__main__":
    # Envelope has no learnable parameters; `exponent` is the only config.
    exponent = 5  # DimeNet++ default envelope_exponent

    key = jax.random.PRNGKey(0)
    k1, k2 = jax.random.split(key)

    # Scaled distances d/cutoff: positive, some inside (<1) / outside (>=1) cutoff.
    # Lane-aligned case -> exercises the zero-copy fast path.
    x = jax.random.uniform(
        k1, (16, 128), dtype=jnp.float32, minval=0.05, maxval=1.5
    )
    out = jax.block_until_ready(envelope(x, exponent))
    ref = envelope_ref(x, exponent)
    assert out.shape == x.shape and out.dtype == x.dtype
    assert jnp.allclose(out, ref, rtol=1e-5, atol=1e-5), "mismatch vs reference"

    # Ragged 1D edge count -> exercises the lane-alignment padding + partial
    # last row-block path.
    x_flat = jax.random.uniform(
        k2, (10_007,), dtype=jnp.float32, minval=0.05, maxval=1.5
    )
    out_flat = jax.block_until_ready(envelope(x_flat, exponent))
    ref_flat = envelope_ref(x_flat, exponent)
    assert out_flat.shape == x_flat.shape and out_flat.dtype == x_flat.dtype
    assert jnp.allclose(out_flat, ref_flat, rtol=1e-5, atol=1e-5), \
        "mismatch vs reference (ragged)"

    print("KERNEL_OK")
</pallas_src>

<mosaic_0001>
module attributes {stable_mosaic.version = 11 : i64} {
  func.func @_envelope_kernel(%arg0: i32, %arg1: memref<16x128xf32, #tpu.memory_space<vmem>>, %arg2: memref<16x128xf32, #tpu.memory_space<vmem>>) attributes {dimension_semantics = [#tpu.dimension_semantics<parallel>], iteration_bounds = array<i64: 1>, scalar_prefetch = 0 : i64, scratch_operands = 0 : i64, tpu.core_type = #tpu.core_type<tc>, window_params = [{transform_indices = @transform_0, window_bounds = array<i64: 16, 128>}, {transform_indices = @transform_1, window_bounds = array<i64: 16, 128>}]} {
    %c0 = arith.constant 0 : index
    %c0_0 = arith.constant 0 : index
    %0 = vector.load %arg1[%c0, %c0_0] : memref<16x128xf32, #tpu.memory_space<vmem>>, vector<16x128xf32>
    %1 = arith.mulf %0, %0 : vector<16x128xf32>
    %2 = arith.mulf %1, %1 : vector<16x128xf32>
    %3 = arith.mulf %0, %2 : vector<16x128xf32>
    %4 = arith.mulf %3, %0 : vector<16x128xf32>
    %5 = arith.mulf %4, %0 : vector<16x128xf32>
    %cst = arith.constant 1.000000e+00 : f32
    %6 = vector.broadcast %cst : f32 to vector<16x128xf32>
    %7 = arith.divf %6, %0 : vector<16x128xf32>
    %cst_1 = arith.constant -2.800000e+01 : f32
    %8 = vector.broadcast %cst_1 : f32 to vector<16x128xf32>
    %9 = arith.mulf %8, %3 : vector<16x128xf32>
    %10 = arith.addf %7, %9 : vector<16x128xf32>
    %cst_2 = arith.constant 4.800000e+01 : f32
    %11 = vector.broadcast %cst_2 : f32 to vector<16x128xf32>
    %12 = arith.mulf %11, %4 : vector<16x128xf32>
    %13 = arith.addf %10, %12 : vector<16x128xf32>
    %cst_3 = arith.constant -2.100000e+01 : f32
    %14 = vector.broadcast %cst_3 : f32 to vector<16x128xf32>
    %15 = arith.mulf %14, %5 : vector<16x128xf32>
    %16 = arith.addf %13, %15 : vector<16x128xf32>
    %cst_4 = arith.constant 1.000000e+00 : f32
    %17 = vector.broadcast %cst_4 : f32 to vector<16x128xf32>
    %18 = arith.cmpf olt, %0, %17 : vector<16x128xf32>
    %cst_5 = arith.constant 0.000000e+00 : f32
    %19 = vector.broadcast %cst_5 : f32 to vector<16x128xf32>
    %20 = arith.select %18, %16, %19 : vector<16x128xi1>, vector<16x128xf32>
    %c0_6 = arith.constant 0 : index
    %c0_7 = arith.constant 0 : index
    %21 = vector.load %arg2[%c0_6, %c0_7] : memref<16x128xf32, #tpu.memory_space<vmem>>, vector<16x128xf32>
    tpu.vector_store %arg2[%c0_6, %c0_7], %20 {strides = array<i32>} : memref<16x128xf32, #tpu.memory_space<vmem>>, vector<16x128xf32>,
    return
  }
  func.func @transform_0(%arg0: i32) -> (i32, i32) {
    %c0_i32 = arith.constant 0 : i32
    %c0_i32_0 = arith.constant 0 : i32
    return %arg0, %c0_i32 : i32, i32
  }
  func.func @transform_1(%arg0: i32) -> (i32, i32) {
    %c0_i32 = arith.constant 0 : i32
    %c0_i32_0 = arith.constant 0 : i32
    return %arg0, %c0_i32 : i32, i32
  }
}

</mosaic_0001>

<bundles_post_ra>
// kernel: tpu_custom_call.1
= control target key start
LH: loop header
LB: loop body
LE: loop exit
PB: predicated region body
PF: predicated region fallthrough
CT: control target
= control target key end

     0   :  { %6 = vsyncpa [#allocation3], 0  ;;  %s174_s0 = inlined_call_operand.hbm [shape: f32[16,128], index: 0, kind: input, shape index: {}]   ;;  %s175_s1 = inlined_call_operand.hbm [shape: f32[16,128], index: 1, kind: output, shape index: {}]  }
   0x1   :  { %7 = vsyncpa [#allocation4], 0  ;;  %s130_s6 = smov [#allocation2]   ;;  %s82_s10 = scalar_lea.hbm %s174_s0, 256 }
   0x2   :  { %s13_s7 = sshll.u32 %s130_s6, 4  ;;  %p83_p0 = scmp.ne.s32.totalorder %s174_s0, %s82_s10  ;;  %s14_s7 = int_to_ptr.vmem [resolvable:$true] %s13_s7 }
   0x3   :  { %p86_p1 = scmp.lt.u32.totalorder %s82_s10, %s174_s0 }
   0x5   :  { %p88_p2 = pnand %p86_p1, %p83_p0 }
   0x7   :  { %91 = shalt.err (!%p88_p2)
}
   0x8   :  { %s92_s15 = scalar_lea.vmem %s14_s7, 256  ;;  %p97_p4 = scmp.lt.s32.totalorder %s14_s7, %s14_s7 }
   0x9   :  { %p93_p3 = scmp.ne.s32.totalorder %s14_s7, %s92_s15  ;;  %p98_p5 = scmp.lt.s32.totalorder %s92_s15, %s92_s15 }
   0xb   :  { %p99_p6 = por %p98_p5, %p97_p4 }
   0xd   :  { %p100_p7 = pnand %p99_p6, %p93_p3 }
   0xf   :  { %103 = shalt.err (!%p100_p7)
}
  0x10   :  { %s131_s16 = smov 128   ;;  %s132_s17 = smov 8  }
  0x11   :  { %19 = dma.hbm_to_vmem [thread:$0]  %s174_s0, 256, %s14_s7, [#allocation3], %s131_s16, %s131_s16, %s132_s17  }
  0x12   :  { %126 = dma.done.wait [#allocation3], 256  }
  0x13   :  { %127 = vsyncadd [#allocation3], 4294967040  ;;  %v23_v0 = vld [vmem:[#allocation2] sm:$0xff]  ;;  %v24_v1 = vld [vmem:[#allocation2 + $0x8] sm:$0xff]  ;;  %s133_s0 = smov [#allocation5]  }
  0x14   :  { %v25_v2 = vmul.f32 %v23_v0, %v23_v0  ;;  %78 = vrcp.f32 %v23_v0  ;;  %v26_v3 = vmul.f32 %v24_v1, %v24_v1  ;;  %vm51_vm0 = vcmp.lt.f32.partialorder %v23_v0, 1.0  ;;  %s62_s20 = sshll.u32 %s133_s0, 4  ;;  %s63_s20 = int_to_ptr.vmem [resolvable:$true] %s62_s20 }
  0x15   :  { %80 = vrcp.f32 %v24_v1  ;;  %vm52_vm1 = vcmp.lt.f32.partialorder %v24_v1, 1.0  ;;  %s104_s21 = scalar_lea.vmem %s63_s20, 256  ;;  %p109_p9 = scmp.lt.s32.totalorder %s63_s20, %s63_s20 }
  0x16   :  { %v27_v4 = vmul.f32 %v25_v2, %v25_v2  ;;  %v28_v5 = vmul.f32 %v26_v3, %v26_v3  ;;  %p105_p8 = scmp.ne.s32.totalorder %s63_s20, %s104_s21  ;;  %p110_p10 = scmp.lt.s32.totalorder %s104_s21, %s104_s21 }
  0x18   :  { %v29_v6 = vmul.f32 %v27_v4, %v23_v0  ;;  %v30_v7 = vmul.f32 %v28_v5, %v24_v1  ;;  %p111_p11 = por %p110_p10, %p109_p9 }
  0x1a   :  { %v31_v8 = vmul.f32 %v29_v6, %v23_v0  ;;  %v32_v9 = vmul.f32 %v30_v7, %v24_v1  ;;  %v39_v10 = vmul.f32 -28.0, %v29_v6  ;;  %v40_v13 = vmul.f32 -28.0, %v30_v7  ;;  %p112_p12 = pnand %p111_p11, %p105_p8 }
  0x1c   :  { %v33_v11 = vmul.f32 %v31_v8, %v23_v0  ;;  %v34_v12 = vmul.f32 %v32_v9, %v24_v1  ;;  %v43_v14 = vmul.f32 48.0, %v31_v8  ;;  %v44_v16 = vmul.f32 48.0, %v32_v9 }
  0x1e   :  { %v79_v15 = vpop.eup %78  ;;  %v47_v19 = vmul.f32 -21.0, %v33_v11  ;;  %v48_v21 = vmul.f32 -21.0, %v34_v12 }
  0x1f   :  { %v81_v17 = vpop.eup %80  ;;  %v41_v18 = vadd.f32 %v79_v15, %v39_v10 }
  0x20   :  { %v42_v20 = vadd.f32 %v81_v17, %v40_v13 }
  0x21   :  { %v45_v22 = vadd.f32 %v43_v14, %v41_v18 }
  0x22   :  { %v46_v23 = vadd.f32 %v44_v16, %v42_v20 }
  0x23   :  { %v49_v24 = vadd.f32 %v47_v19, %v45_v22 }
  0x24   :  { %v50_v25 = vadd.f32 %v48_v21, %v46_v23 }
  0x25   :  { %v53_v26 = vsel %vm51_vm0, %v49_v24, 0.0 }
  0x26   :  { %55 = vst [vmem:[#allocation5] sm:$0xff] %v53_v26  ;;  %v54_v27 = vsel %vm52_vm1, %v50_v25, 0.0 }
  0x27   :  { %56 = vst [vmem:[#allocation5 + $0x8] sm:$0xff] %v54_v27 }
  0x28   :  { %115 = shalt.err (!%p112_p12)
}
  0x29   :  { %s116_s24 = scalar_lea.hbm %s175_s1, 256 }
  0x2a   :  { %p117_p13 = scmp.ne.s32.totalorder %s175_s1, %s116_s24  ;;  %p120_p0 = scmp.lt.u32.totalorder %s116_s24, %s175_s1 }
  0x2c   :  { %p122_p1 = pnand %p120_p0, %p117_p13 }
  0x2e   :  { %125 = shalt.err (!%p122_p1)
}
  0x2f   :  { %68 = dma.vmem_to_hbm [thread:$0]  %s63_s20, 256, %s175_s1, [#allocation4], %s131_s16, %s131_s16, %s132_s17  }
  0x30   :  { %128 = dma.done.wait [#allocation4], 256  }
  0x31   :  { %129 = vsyncadd [#allocation4], 4294967040 }
  0x32   :  { %72 = vsyncpa [#allocation3], 1 }
  0x33   :  { %73 = vsyncpa [#allocation4], 1 }

</bundles_post_ra>
